<compile_context>
chip_gen: v6e
topology: v6e:2x2x1
jax: 0.10.0
libtpu: 0.0.40
codegen_flags: <defaults>
</compile_context>

<pallas_src>
import jax
import jax.numpy as jnp
from jax.experimental import pallas as pl
from jax.experimental.pallas import tpu as pltpu


def _chamfer_kernel(x_ref, yt_ref, o_ref):
    # x_ref:  (Bb, N, D)  point cloud x
    # yt_ref: (Bb, D, M)  point cloud y, pre-transposed (lane-dense RHS)
    # o_ref:  (1, 1, Bb)  per-batch chamfer values (lane-dense)
    x = x_ref[...]                                   # (Bb, N, D) f32
    yt = yt_ref[...]                                 # (Bb, D, M) f32

    x_sq = jnp.sum(x * x, axis=-1, keepdims=True)    # (Bb, N, 1)
    y_sq = jnp.sum(yt * yt, axis=1, keepdims=True)   # (Bb, 1, M)

    # Fold the -2 factor into the (cheap) N*D operand instead of the N*M product.
    xm2 = x * (-2.0)                                 # (Bb, N, D)
    cross = jnp.einsum(
        "bnd,bdm->bnm", xm2, yt, preferred_element_type=jnp.float32
    )                                                # (Bb, N, M) on MXU

    # squared L2 pairwise distances: ||x||^2 + ||y||^2 - 2 x.y
    d = cross + x_sq + y_sq                          # (Bb, N, M)

    min_x = jnp.min(d, axis=2)                       # (Bb, N) nearest y per x
    min_y = jnp.min(d, axis=1)                       # (Bb, M) nearest x per y

    # Clamp tiny negatives (cancellation) AFTER the min: min(max(d,0)) == max(min d, 0).
    cham_x = jnp.mean(jnp.maximum(min_x, 0.0), axis=1)   # (Bb,)
    cham_y = jnp.mean(jnp.maximum(min_y, 0.0), axis=1)   # (Bb,)

    o_ref[...] = (cham_x + cham_y)[None, None, :]


def chamfer_distance_l2(x, y, *, block_b=None):
    """x: (B, N, 3), y: (B, M, 3) -> scalar float32 chamfer-L2 loss."""
    x = x.astype(jnp.float32)
    y = y.astype(jnp.float32)
    B, N, D = x.shape
    Bm, M, Dm = y.shape
    assert B == Bm and D == Dm

    # Layout plumbing (not compute hoisting): lane-dense RHS for the kernel.
    y_t = jnp.transpose(y, (0, 2, 1))                # (B, D, M)

    # --- derive batch block from a conservative VMEM budget --------------------
    def _rup(v, m):
        return ((v + m - 1) // m) * m

    # Per-batch VMEM footprint of the kernel's buffers, including (8,128) padding.
    x_bytes = _rup(N, 8) * _rup(D, 128) * 4          # (N, D) input block
    yt_bytes = _rup(D, 8) * _rup(M, 128) * 4         # (D, M) input block
    d_bytes = _rup(N, 8) * _rup(M, 128) * 4          # (N, M) distance temp
    per_b = 2 * (x_bytes + yt_bytes) + 2 * d_bytes   # double-buffered inputs + temp headroom

    VMEM_LIMIT = 32 * 1024 * 1024                    # explicit; safe on v5e/v6e (128 MiB) and v7x (64 MiB)
    BUDGET = 24 * 1024 * 1024                        # leave headroom under the limit
    if block_b is None:
        block_b = max(1, min(B, BUDGET // max(per_b, 1), 128))

    # Pad the batch axis to a multiple of block_b (padded entries sliced off below).
    G = pl.cdiv(B, block_b)
    Bp = G * block_b
    if Bp != B:
        x = jnp.pad(x, ((0, Bp - B), (0, 0), (0, 0)))
        y_t = jnp.pad(y_t, ((0, Bp - B), (0, 0), (0, 0)))

    out = pl.pallas_call(
        _chamfer_kernel,
        out_shape=jax.ShapeDtypeStruct((G, 1, block_b), jnp.float32),
        grid_spec=pl.GridSpec(
            grid=(G,),
            in_specs=[
                pl.BlockSpec((block_b, N, D), lambda g: (g, 0, 0)),
                pl.BlockSpec((block_b, D, M), lambda g: (g, 0, 0)),
            ],
            out_specs=pl.BlockSpec((1, 1, block_b), lambda g: (g, 0, 0)),
        ),
        compiler_params=pltpu.CompilerParams(
            dimension_semantics=("parallel",),      # keep batch axis parallel (2 TCs on v7x)
            vmem_limit_bytes=VMEM_LIMIT,
        ),
    )(x, y_t)

    # Contiguous lane-dense read of per-batch values; drop batch padding, then
    # batch_reduction="mean".
    per_batch = out.reshape(-1)[:B]
    return jnp.mean(per_batch)


def _chamfer_ref(x, y):
    # Pure-JAX reference (direct squared differences) for correctness checking.
    d = jnp.sum((x[:, :, None, :] - y[:, None, :, :]) ** 2, axis=-1)  # (B, N, M)
    cham_x = jnp.mean(jnp.min(d, axis=2), axis=1)   # (B,)
    cham_y = jnp.mean(jnp.min(d, axis=1), axis=1)   # (B,)
    return jnp.mean(cham_x) + jnp.mean(cham_y)


if __name__ == "__main__":
    key = jax.random.PRNGKey(0)
    kx, ky = jax.random.split(key)
    B, N, M, D = 2, 64, 96, 3
    x = jax.random.normal(kx, (B, N, D), dtype=jnp.float32)
    y = jax.random.normal(ky, (B, M, D), dtype=jnp.float32)

    loss = jax.jit(chamfer_distance_l2)(x, y)
    jax.block_until_ready(loss)

    ref = _chamfer_ref(x, y)
    assert jnp.allclose(loss, ref, rtol=1e-5, atol=1e-5), (loss, ref)

    print("KERNEL_OK")
</pallas_src>

<mosaic_0001>
module attributes {stable_mosaic.version = 11 : i64} {
  func.func @_chamfer_kernel(%arg0: i32, %arg1: memref<2x64x3xf32, #tpu.memory_space<vmem>>, %arg2: memref<2x3x96xf32, #tpu.memory_space<vmem>>, %arg3: memref<1x1x2xf32, #tpu.memory_space<vmem>>) attributes {dimension_semantics = [#tpu.dimension_semantics<parallel>], iteration_bounds = array<i64: 1>, scalar_prefetch = 0 : i64, scratch_operands = 0 : i64, tpu.core_type = #tpu.core_type<tc>, window_params = [{transform_indices = @transform_0, window_bounds = array<i64: 2, 64, 3>}, {transform_indices = @transform_1, window_bounds = array<i64: 2, 3, 96>}, {transform_indices = @transform_2, window_bounds = array<i64: 1, 1, 2>}]} {
    %c0 = arith.constant 0 : index
    %c0_0 = arith.constant 0 : index
    %c0_1 = arith.constant 0 : index
    %0 = vector.load %arg1[%c0, %c0_0, %c0_1] : memref<2x64x3xf32, #tpu.memory_space<vmem>>, vector<2x64x3xf32>
    %c0_2 = arith.constant 0 : index
    %c0_3 = arith.constant 0 : index
    %c0_4 = arith.constant 0 : index
    %1 = vector.load %arg2[%c0_2, %c0_3, %c0_4] : memref<2x3x96xf32, #tpu.memory_space<vmem>>, vector<2x3x96xf32>
    %2 = arith.mulf %0, %0 : vector<2x64x3xf32>
    %cst = arith.constant dense<0.000000e+00> : vector<2x64xf32>
    %3 = vector.multi_reduction <add>, %2, %cst [2] : vector<2x64x3xf32> to vector<2x64xf32>
    %4 = vector.shape_cast %3 : vector<2x64xf32> to vector<2x64x1xf32>
    %5 = arith.mulf %1, %1 : vector<2x3x96xf32>
    %cst_5 = arith.constant dense<0.000000e+00> : vector<2x96xf32>
    %6 = vector.multi_reduction <add>, %5, %cst_5 [1] : vector<2x3x96xf32> to vector<2x96xf32>
    %7 = vector.shape_cast %6 : vector<2x96xf32> to vector<2x1x96xf32>
    %cst_6 = arith.constant -2.000000e+00 : f32
    %8 = vector.broadcast %cst_6 : f32 to vector<2x64x3xf32>
    %9 = arith.mulf %0, %8 : vector<2x64x3xf32>
    "tpu.trace_start"() <{level = 10 : i32, message = "bnd,bdm->bnm"}> : () -> ()
    %cst_7 = arith.constant dense<0.000000e+00> : vector<2x64x96xf32>
    %10 = tpu.matmul %9, %1, %cst_7 {dimension_numbers = #tpu.dot_dimension_numbers<[2], [1], [1], [2], [0, 0, 0, 1, 1, 2], [0], [0]>} : vector<2x64x3xf32>, vector<2x3x96xf32>, vector<2x64x96xf32> -> vector<2x64x96xf32>
    "tpu.trace_stop"() : () -> ()
    %11 = vector.broadcast %4 : vector<2x64x1xf32> to vector<2x64x96xf32>
    %12 = arith.addf %10, %11 : vector<2x64x96xf32>
    %13 = vector.broadcast %7 : vector<2x1x96xf32> to vector<2x64x96xf32>
    %14 = arith.addf %12, %13 : vector<2x64x96xf32>
    %cst_8 = arith.constant dense<0x7F800000> : vector<2x64xf32>
    %15 = vector.multi_reduction <minimumf>, %14, %cst_8 [2] : vector<2x64x96xf32> to vector<2x64xf32>
    %cst_9 = arith.constant dense<0x7F800000> : vector<2x96xf32>
    %16 = vector.multi_reduction <minimumf>, %14, %cst_9 [1] : vector<2x64x96xf32> to vector<2x96xf32>
    %cst_10 = arith.constant 0.000000e+00 : f32
    %17 = vector.broadcast %cst_10 : f32 to vector<2x64xf32>
    %18 = arith.maximumf %15, %17 : vector<2x64xf32>
    %cst_11 = arith.constant dense<0.000000e+00> : vector<2xf32>
    %19 = vector.multi_reduction <add>, %18, %cst_11 [1] : vector<2x64xf32> to vector<2xf32>
    %cst_12 = arith.constant 6.400000e+01 : f32
    %20 = vector.broadcast %cst_12 : f32 to vector<2xf32>
    %21 = arith.divf %19, %20 : vector<2xf32>
    %cst_13 = arith.constant 0.000000e+00 : f32
    %22 = vector.broadcast %cst_13 : f32 to vector<2x96xf32>
    %23 = arith.maximumf %16, %22 : vector<2x96xf32>
    %cst_14 = arith.constant dense<0.000000e+00> : vector<2xf32>
    %24 = vector.multi_reduction <add>, %23, %cst_14 [1] : vector<2x96xf32> to vector<2xf32>
    %cst_15 = arith.constant 9.600000e+01 : f32
    %25 = vector.broadcast %cst_15 : f32 to vector<2xf32>
    %26 = arith.divf %24, %25 : vector<2xf32>
    %27 = arith.addf %21, %26 : vector<2xf32>
    %28 = vector.shape_cast %27 : vector<2xf32> to vector<1x1x2xf32>
    %c0_16 = arith.constant 0 : index
    %c0_17 = arith.constant 0 : index
    %c0_18 = arith.constant 0 : index
    %29 = vector.load %arg3[%c0_16, %c0_17, %c0_18] : memref<1x1x2xf32, #tpu.memory_space<vmem>>, vector<1x1x2xf32>
    tpu.vector_store %arg3[%c0_16, %c0_17, %c0_18], %28 {strides = array<i32>} : memref<1x1x2xf32, #tpu.memory_space<vmem>>, vector<1x1x2xf32>,
    return
  }
  func.func @transform_0(%arg0: i32) -> (i32, i32, i32) {
    %c0_i32 = arith.constant 0 : i32
    %c0_i32_0 = arith.constant 0 : i32
    %c0_i32_1 = arith.constant 0 : i32
    return %arg0, %c0_i32, %c0_i32_0 : i32, i32, i32
  }
  func.func @transform_1(%arg0: i32) -> (i32, i32, i32) {
    %c0_i32 = arith.constant 0 : i32
    %c0_i32_0 = arith.constant 0 : i32
    %c0_i32_1 = arith.constant 0 : i32
    return %arg0, %c0_i32, %c0_i32_0 : i32, i32, i32
  }
  func.func @transform_2(%arg0: i32) -> (i32, i32, i32) {
    %c0_i32 = arith.constant 0 : i32
    %c0_i32_0 = arith.constant 0 : i32
    %c0_i32_1 = arith.constant 0 : i32
    return %arg0, %c0_i32, %c0_i32_0 : i32, i32, i32
  }
}

</mosaic_0001>

<bundles_post_ra>
// kernel: chamfer_distance_l2.1
= control target key start
LH: loop header
LB: loop body
LE: loop exit
PB: predicated region body
PF: predicated region fallthrough
CT: control target
= control target key end

     0   :  { %vm151_vm0 = vcmask 1042432   ;;  %vm45_vm1 = vcmask 23552   ;;  %vm96_vm2 = vcmask 780288   ;;  %vm408_vm3 = vcmask 785408   ;;  %s880_s1 = inlined_call_operand.vmem [shape: f32[2,3,96], index: 1, kind: input, shape index: {}]   ;;  %s881_s0 = inlined_call_operand.vmem [shape: f32[2,64,3], index: 0, kind: input, shape index: {}]   ;;  %s882_s2 = inlined_call_operand.vmem [shape: f32[1,1,2], index: 2, kind: output, shape index: {}]  }
   0x1   :  { %v725_v0 = vld [vmem:[%s880_s1] sm:$0x7]  ;;  %v730_v1 = vld [vmem:[%s880_s1 + $0x4] sm:$0x7]  ;;  %v12_v5 = vld [vmem:[%s881_s0 + $0x8] sm:$0xff]  ;;  %vm609_vm4 = vcmask 1041409  }
   0x2   :  { %v11_v2 = vld [vmem:[%s881_s0] sm:$0xff]  ;;  %679 = vmatprep.subr.msk.mxu0 %vm151_vm0, %v725_v0  ;;  %693 = vmatprep.subr.msk.mxu1 %vm151_vm0, %v730_v1  ;;  %v20_v6 = vld [vmem:[%s881_s0 + $0x48] sm:$0xff]  ;;  %v112_v8 = vmul.f32 -2.0, %v12_v5  ;;  %v13_v10 = vld [vmem:[%s881_s0 + $0x10] sm:$0xff]  ;;  %v30_v36 = vmul.f32 %v12_v5, %v12_v5  ;;  %vm624_vm5 = vcmask 779264   ;;  %vm526_vm6 = vcmask 130112  }
   0x3   :  { %v111_v3 = vmul.f32 -2.0, %v11_v2  ;;  %v19_v4 = vld [vmem:[%s881_s0 + $0x40] sm:$0xff]  ;;  %680 = vmatpush3.msk.msra.mxu0 %vm151_vm0, %v725_v0  ;;  %694 = vmatpush3.msk.msra.mxu1 %vm151_vm0, %v730_v1  ;;  %v120_v9 = vmul.f32 -2.0, %v20_v6  ;;  %v21_v11 = vld [vmem:[%s881_s0 + $0x50] sm:$0xff]  ;;  %v14_v12 = vld [vmem:[%s881_s0 + $0x18] sm:$0xff]  ;;  %v113_v13 = vmul.f32 -2.0, %v13_v10  ;;  %v29_v20 = vmul.f32 %v11_v2, %v11_v2 }
   0x4   :  { %v119_v7 = vmul.f32 -2.0, %v19_v4  ;;  %v121_v14 = vmul.f32 -2.0, %v21_v11  ;;  %v22_v15 = vld [vmem:[%s881_s0 + $0x58] sm:$0xff]  ;;  %v15_v16 = vld [vmem:[%s881_s0 + $0x20] sm:$0xff]  ;;  %v37_v17 = vmul.f32 %v19_v4, %v19_v4  ;;  %v114_v18 = vmul.f32 -2.0, %v14_v12  ;;  %v16_v23 = vld [vmem:[%s881_s0 + $0x28] sm:$0xff] }
   0x5   :  { %681 = vmatprep.mubr.msk.f32.mxu0 %vm45_vm1, %v111_v3  ;;  %v23_v19 = vld [vmem:[%s881_s0 + $0x60] sm:$0xff]  ;;  %v122_v21 = vmul.f32 -2.0, %v22_v15  ;;  %v115_v22 = vmul.f32 -2.0, %v15_v16  ;;  %v24_v24 = vld [vmem:[%s881_s0 + $0x68] sm:$0xff]  ;;  %v38_v25 = vmul.f32 %v20_v6, %v20_v6  ;;  %v17_v27 = vld [vmem:[%s881_s0 + $0x30] sm:$0xff]  ;;  %v116_v30 = vmul.f32 -2.0, %v16_v23 }
   0x6   :  { %695 = vmatprep.mubr.msk.f32.mxu1 %vm45_vm1, %v119_v7  ;;  %682 = vmatmul.mubr.msk.f32.vlgmr.msra.gmra.mxu0 %vm45_vm1, %v112_v8  ;;  %v123_v26 = vmul.f32 -2.0, %v23_v19  ;;  %v25_v28 = vld [vmem:[%s881_s0 + $0x70] sm:$0xff]  ;;  %v70_v29 = vsel %vm45_vm1, %v37_v17, 0.0  ;;  %v124_v31 = vmul.f32 -2.0, %v24_v24  ;;  %v46_v32 = vsel %vm45_vm1, %v29_v20, 0.0  ;;  %v18_v34 = vld [vmem:[%s881_s0 + $0x38] sm:$0xff] }
   0x7   :  { %696 = vmatmul.mubr.msk.f32.vlgmr.msra.gmra.mxu1 %vm45_vm1, %v120_v9  ;;  %684 = vmatprep.mubr.msk.f32.mxu0 %vm45_vm1, %v113_v13  ;;  %v117_v33 = vmul.f32 -2.0, %v17_v27  ;;  %v73_v35 = vsel %vm45_vm1, %v38_v25, 0.0  ;;  %v39_v37 = vmul.f32 %v21_v11, %v21_v11  ;;  %v125_v38 = vmul.f32 -2.0, %v25_v28  ;;  %v26_v39 = vld [vmem:[%s881_s0 + $0x78] sm:$0xff] }
   0x8   :  { %698 = vmatprep.mubr.msk.f32.mxu1 %vm45_vm1, %v121_v14  ;;  %71 = vadd.xlane.f32.xlu1 %v70_v29  ;;  %v49_v40 = vsel %vm45_vm1, %v30_v36, 0.0  ;;  %v31_v41 = vmul.f32 %v13_v10, %v13_v10  ;;  %v118_v42 = vmul.f32 -2.0, %v18_v34  ;;  %v126_v43 = vmul.f32 -2.0, %v26_v39 }
   0x9   :  { %47 = vadd.xlane.f32.xlu0 %v46_v32  ;;  %v76_v44 = vsel %vm45_vm1, %v39_v37, 0.0  ;;  %v40_v45 = vmul.f32 %v22_v15, %v22_v15  ;;  %v32_v47 = vmul.f32 %v14_v12, %v14_v12  ;;  %v41_v49 = vmul.f32 %v23_v19, %v23_v19 }
   0xa   :  { %685 = vmatmul.mubr.msk.f32.gmra.mxu0 %vm45_vm1, %v114_v18  ;;  %v52_v46 = vsel %vm45_vm1, %v31_v41, 0.0  ;;  %v33_v51 = vmul.f32 %v15_v16, %v15_v16  ;;  %v42_v53 = vmul.f32 %v24_v24, %v24_v24  ;;  %v34_v55 = vmul.f32 %v16_v23, %v16_v23 }
   0xb   :  { %699 = vmatmul.mubr.msk.f32.gmra.mxu1 %vm45_vm1, %v122_v21  ;;  %687 = vmatprep.mubr.msk.f32.mxu0 %vm45_vm1, %v115_v22  ;;  %v79_v48 = vsel %vm45_vm1, %v40_v45, 0.0  ;;  %v55_v50 = vsel %vm45_vm1, %v32_v47, 0.0  ;;  %v82_v52 = vsel %vm45_vm1, %v41_v49, 0.0  ;;  %v43_v57 = vmul.f32 %v25_v28, %v25_v28 }
   0xc   :  { %701 = vmatprep.mubr.msk.f32.mxu1 %vm45_vm1, %v123_v26  ;;  %74 = vadd.xlane.f32.xlu1 %v73_v35  ;;  %v58_v54 = vsel %vm45_vm1, %v33_v51, 0.0  ;;  %v85_v56 = vsel %vm45_vm1, %v42_v53, 0.0  ;;  %v61_v58 = vsel %vm45_vm1, %v34_v55, 0.0  ;;  %v35_v59 = vmul.f32 %v17_v27, %v17_v27 }
   0xd   :  { %50 = vadd.xlane.f32.xlu0 %v49_v40  ;;  %v88_v60 = vsel %vm45_vm1, %v43_v57, 0.0  ;;  %v44_v61 = vmul.f32 %v26_v39, %v26_v39  ;;  %v36_v63 = vmul.f32 %v18_v34, %v18_v34  ;;  %v94_v6 = vmul.f32 %v725_v0, %v725_v0 }
   0xe   :  { %688 = vmatmul.mubr.msk.f32.gmra.mxu0 %vm45_vm1, %v116_v30  ;;  %v64_v62 = vsel %vm45_vm1, %v35_v59, 0.0  ;;  %v95_v7 = vmul.f32 %v730_v1, %v730_v1  ;;  %vm533_vm7 = vcmask 195712   ;;  %vm540_vm8 = vcmask 261312  }
   0xf   :  { %702 = vmatmul.mubr.msk.f32.gmra.mxu1 %vm45_vm1, %v124_v31  ;;  %690 = vmatprep.mubr.msk.f32.mxu0 %vm45_vm1, %v117_v33  ;;  %v91_v2 = vsel %vm45_vm1, %v44_v61, 0.0  ;;  %v67_v3 = vsel %vm45_vm1, %v36_v63, 0.0  ;;  %v97_v10 = vsel %vm96_vm2, %v94_v6, 0.0  ;;  %vm547_vm9 = vcmask 326912  }
  0x10   :  { %704 = vmatprep.mubr.msk.f32.mxu1 %vm45_vm1, %v125_v38  ;;  %77 = vadd.xlane.f32.xlu1 %v76_v44  ;;  %v104_v11 = vsel %vm96_vm2, %v95_v7, 0.0  ;;  %v98_v12 = vrot.slane %v97_v10, 4  ;;  %vm554_vm10 = vcmask 392512   ;;  %vm561_vm11 = vcmask 458112  }
  0x11   :  { %53 = vadd.xlane.f32.xlu0 %v52_v46  ;;  %v105_v14 = vrot.slane %v104_v11, 4  ;;  %vm568_vm12 = vcmask 523712   ;;  %vm612_vm13 = vcmask 517120   ;;  %vm637_vm14 = vcmask 8192  }
  0x12   :  { %691 = vmatmul.mubr.msk.f32.gmra.mxu0 %vm45_vm1, %v118_v42  ;;  %v99_v16 = vadd.f32 %v98_v12, %v97_v10 }
  0x13   :  { %705 = vmatmul.mubr.msk.f32.gmra.mxu1 %vm45_vm1, %v126_v43  ;;  %v106_v17 = vadd.f32 %v105_v14, %v104_v11 }
  0x14   :  { %80 = vadd.xlane.f32.xlu1 %v79_v48  ;;  %v100_v19 = vrot.slane %v99_v16, 2 }
  0x15   :  { %56 = vadd.xlane.f32.xlu0 %v55_v50  ;;  %v107_v21 = vrot.slane %v106_v17, 2 }
  0x16   :  { %v101_v22 = vadd.f32 %v100_v19, %v99_v16 }
  0x17   :  { %v108_v23 = vadd.f32 %v107_v21, %v106_v17 }
  0x18   :  { %83 = vadd.xlane.f32.xlu1 %v82_v52  ;;  %v102_v25 = vrot.slane %v101_v22, 1 }
  0x19   :  { %59 = vadd.xlane.f32.xlu0 %v58_v54  ;;  %v109_v1 = vrot.slane %v108_v23, 1 }
  0x1a   :  { %v820_v27 = vadd.f32 %v102_v25, %v101_v22 }
  0x1b   :  { %v822_v30 = vadd.f32 %v109_v1, %v108_v23 }
  0x1c   :  { %86 = vadd.xlane.f32.xlu1 %v85_v56 }
  0x1d   :  { %62 = vadd.xlane.f32.xlu0 %v61_v58 }
  0x20   :  { %89 = vadd.xlane.f32.xlu1 %v88_v60 }
  0x21   :  { %65 = vadd.xlane.f32.xlu0 %v64_v62 }
  0x24   :  { %92 = vadd.xlane.f32.xlu1 %v91_v2 }
  0x25   :  { %68 = vadd.xlane.f32.xlu0 %v67_v3 }
  0x91   :  { %v72_v5 = vpop.xlane.xlu1 %71 }
  0x92   :  { %v48_v4 = vpop.xlane.xlu0 %47 }
  0x95   :  { %v75_v9 = vpop.xlane.xlu1 %74 }
  0x96   :  { %v51_v8 = vpop.xlane.xlu0 %50 }
  0x99   :  { %v78_v15 = vpop.xlane.xlu1 %77 }
  0x9a   :  { %v54_v13 = vpop.xlane.xlu0 %53 }
  0x9d   :  { %v81_v20 = vpop.xlane.xlu1 %80 }
  0x9e   :  { %v57_v18 = vpop.xlane.xlu0 %56 }
  0xa1   :  { %v84_v24 = vpop.xlane.xlu1 %83 }
  0xa2   :  { %v60_v0 = vpop.xlane.xlu0 %59 }
  0xa5   :  { %v87_v28 = vpop.xlane.xlu1 %86 }
  0xa6   :  { %v63_v26 = vpop.xlane.xlu0 %62 }
  0xa9   :  { %v90_v44 = vpop.xlane.xlu1 %89 }
  0xaa   :  { %v66_v40 = vpop.xlane.xlu0 %65 }
  0xad   :  { %v93_v6 = vpop.xlane.xlu1 %92 }
  0xae   :  { %v69_v63 = vpop.xlane.xlu0 %68 }
  0xc6   :  { %v683_v29 = vpop.f32.mrf.mxu0 }
  0xc7   :  { %v697_v31 = vpop.f32.mrf.mxu1  ;;  %v227_v32 = vadd.f32 %v683_v29, %v51_v8 }
  0xc8   :  { %v359_v33 = vadd.f32 %v697_v31, %v75_v9  ;;  %v221_v34 = vpop.f32.mrf.mxu0 }
  0xc9   :  { %v222_v35 = vadd.f32 %v221_v34, %v48_v4  ;;  %v353_v36 = vpop.f32.mrf.mxu1  ;;  %v393_v37 = vadd.f32 %v227_v32, %v820_v27 }
  0xca   :  { %v354_v38 = vadd.f32 %v353_v36, %v72_v5  ;;  %v686_v39 = vpop.f32.mrf.mxu0  ;;  %v401_v46 = vadd.f32 %v359_v33, %v822_v30 }
  0xcb   :  { %v700_v41 = vpop.f32.mrf.mxu1  ;;  %v237_v42 = vadd.f32 %v686_v39, %v57_v18  ;;  %v826_v43 = vsel %vm408_vm3, %v393_v37, inf  ;;  %v392_v45 = vadd.f32 %v222_v35, %v820_v27 }
  0xcc   :  { %v369_v47 = vadd.f32 %v700_v41, %v81_v20  ;;  %v231_v48 = vpop.f32.mrf.mxu0  ;;  %413 = vmin.xlane.f32.xlu1 %v826_v43  ;;  %v400_v52 = vadd.f32 %v354_v38, %v822_v30  ;;  %v436_v58 = vsel %vm408_vm3, %v401_v46, inf }
  0xcd   :  { %v232_v49 = vadd.f32 %v231_v48, %v54_v13  ;;  %v363_v50 = vpop.f32.mrf.mxu1  ;;  %v409_v51 = vsel %vm408_vm3, %v392_v45, inf  ;;  %v395_v53 = vadd.f32 %v237_v42, %v820_v27 }
  0xce   :  { %v364_v54 = vadd.f32 %v363_v50, %v78_v15  ;;  %v689_v55 = vpop.f32.mrf.mxu0  ;;  %410 = vmin.xlane.f32.xlu0 %v409_v51  ;;  %v403_v59 = vadd.f32 %v369_v47, %v822_v30  ;;  %v433_v7 = vsel %vm408_vm3, %v400_v52, inf }
  0xcf   :  { %v703_v56 = vpop.f32.mrf.mxu1  ;;  %v247_v57 = vadd.f32 %v689_v55, %v63_v26  ;;  %v394_v60 = vadd.f32 %v232_v49, %v820_v27  ;;  %v418_v2 = vsel %vm408_vm3, %v395_v53, inf }
  0xd0   :  { %v379_v61 = vadd.f32 %v703_v56, %v87_v28  ;;  %v241_v62 = vpop.f32.mrf.mxu0  ;;  %437 = vmin.xlane.f32.xlu1 %v436_v58  ;;  %v402_v3 = vadd.f32 %v364_v54, %v822_v30  ;;  %v442_v15 = vsel %vm408_vm3, %v403_v59, inf  ;;  %v458_v16 = vmin.f32 %v826_v43, %v418_v2 }
  0xd1   :  { %v242_v4 = vadd.f32 %v241_v62, %v60_v0  ;;  %v373_v5 = vpop.f32.mrf.mxu1  ;;  %v415_v8 = vsel %vm408_vm3, %v394_v60, inf  ;;  %v397_v9 = vadd.f32 %v247_v57, %v820_v27  ;;  %v471_v32 = vmin.f32 %v436_v58, %v442_v15 }
  0xd2   :  { %v374_v10 = vadd.f32 %v373_v5, %v84_v24  ;;  %v692_v11 = vpop.f32.mrf.mxu0  ;;  %434 = vmin.xlane.f32.xlu0 %v433_v7  ;;  %v405_v12 = vadd.f32 %v379_v61, %v822_v30  ;;  %v439_v20 = vsel %vm408_vm3, %v402_v3, inf  ;;  %v457_v21 = vmin.f32 %v409_v51, %v415_v8 }
  0xd3   :  { %v706_v13 = vpop.f32.mrf.mxu1  ;;  %v257_v14 = vadd.f32 %v692_v11, %v69_v63  ;;  %v396_v17 = vadd.f32 %v242_v4, %v820_v27  ;;  %v424_v24 = vsel %vm408_vm3, %v397_v9, inf  ;;  %v470_v33 = vmin.f32 %v433_v7, %v439_v20 }
  0xd4   :  { %v389_v18 = vadd.f32 %v706_v13, %v93_v6  ;;  %v251_v19 = vpop.f32.mrf.mxu0  ;;  %443 = vmin.xlane.f32.xlu1 %v442_v15  ;;  %v404_v22 = vadd.f32 %v374_v10, %v822_v30  ;;  %v448_v28 = vsel %vm408_vm3, %v405_v12, inf  ;;  %v460_v36 = vmin.f32 %v458_v16, %v424_v24 }
  0xd5   :  { %v252_v0 = vadd.f32 %v251_v19, %v66_v40  ;;  %v383_v23 = vpop.f32.mrf.mxu1  ;;  %v421_v25 = vsel %vm408_vm3, %v396_v17, inf  ;;  %v399_v1 = vadd.f32 %v257_v14, %v820_v27  ;;  %v473_v40 = vmin.f32 %v471_v32, %v448_v28 }
  0xd6   :  { %v384_v26 = vadd.f32 %v383_v23, %v90_v44  ;;  %419 = vmin.xlane.f32.xlu0 %v418_v2  ;;  %v445_v29 = vsel %vm408_vm3, %v404_v22, inf  ;;  %v407_v31 = vadd.f32 %v389_v18, %v822_v30  ;;  %v459_v37 = vmin.f32 %v457_v21, %v421_v25 }
  0xd7   :  { %v398_v34 = vadd.f32 %v252_v0, %v820_v27  ;;  %v430_v35 = vsel %vm408_vm3, %v399_v1, inf  ;;  %v472_v41 = vmin.f32 %v470_v33, %v445_v29  ;;  %v515_v6 = vlaneseq }
  0xd8   :  { %440 = vmin.xlane.f32.xlu1 %v439_v20  ;;  %v406_v38 = vadd.f32 %v384_v26, %v822_v30  ;;  %v454_v39 = vsel %vm408_vm3, %v407_v31, inf  ;;  %v462_v45 = vmin.f32 %v460_v36, %v430_v35 }
  0xd9   :  { %v427_v42 = vsel %vm408_vm3, %v398_v34, inf  ;;  %v475_v27 = vmin.f32 %v473_v40, %v454_v39  ;;  %v516_v9 = vand.u32 127, %v515_v6  ;;  %v518_v13 = vshrl.u32 %v515_v6, 7 }
  0xda   :  { %416 = vmin.xlane.f32.xlu0 %v415_v8  ;;  %v451_v43 = vsel %vm408_vm3, %v406_v38, inf  ;;  %v461_v44 = vmin.f32 %v459_v37, %v427_v42 }
  0xdb   :  { %v474_v46 = vmin.f32 %v472_v41, %v451_v43  ;;  %v528_v11 = vadd.s32 4294967280, %v516_v9  ;;  %v521_v14 = vadd.s32 4294967288, %v516_v9  ;;  %v535_v15 = vadd.s32 4294967272, %v516_v9 }
  0xdc   :  { %449 = vmin.xlane.f32.xlu1 %v448_v28  ;;  %v463_v47 = vmin.f32 %v461_v44, %v462_v45  ;;  %v861_v18 = vsub.s32 %v516_v9, %v518_v13  ;;  %v556_v32 = vadd.s32 4294967248, %v516_v9  ;;  %v563_v36 = vadd.s32 4294967240, %v516_v9 }
  0xdd   :  { %v476_v48 = vmin.f32 %v474_v46, %v475_v27  ;;  %v531_v20 = vsub.s32 %v528_v11, %v518_v13  ;;  %v538_v26 = vsub.s32 %v535_v15, %v518_v13 }
  0xde   :  { %425 = vmin.xlane.f32.xlu0 %v424_v24  ;;  %v464_v49 = vrot.slane %v463_v47, 4  ;;  %v542_v24 = vadd.s32 4294967264, %v516_v9  ;;  %v559_v27 = vsub.s32 %v556_v32, %v518_v13 }
  0xdf   :  { %v477_v50 = vrot.slane %v476_v48, 4 }
  0xe0   :  { %446 = vmin.xlane.f32.xlu1 %v445_v29  ;;  %v465_v30 = vmin.f32 %v463_v47, %v464_v49  ;;  %v549_v29 = vadd.s32 4294967256, %v516_v9 }
  0xe1   :  { %v478_v51 = vmin.f32 %v476_v48, %v477_v50 }
  0xe2   :  { %422 = vmin.xlane.f32.xlu0 %v421_v25  ;;  %v466_v52 = vrot.slane %v465_v30, 2  ;;  %v524_v25 = vsub.s32 %v521_v14, %v518_v13  ;;  %v552_v46 = vsub.s32 %v549_v29, %v518_v13 }
  0xe3   :  { %v479_v53 = vrot.slane %v478_v51, 2 }
  0xe4   :  { %452 = vmin.xlane.f32.xlu1 %v451_v43  ;;  %v467_v54 = vmin.f32 %v465_v30, %v466_v52  ;;  %v566_v30 = vsub.s32 %v563_v36, %v518_v13 }
  0xe5   :  { %v480_v55 = vmin.f32 %v478_v51, %v479_v53 }
  0xe6   :  { %428 = vmin.xlane.f32.xlu0 %v427_v42  ;;  %v468_v56 = vrot.slane %v467_v54, 1 }
  0xe7   :  { %v481_v57 = vrot.slane %v480_v55, 1 }
  0xe8   :  { %455 = vmin.xlane.f32.xlu1 %v454_v39  ;;  %v469_v58 = vmin.f32 %v467_v54, %v468_v56  ;;  %v545_v39 = vsub.s32 %v542_v24, %v518_v13 }
  0xe9   :  { %v482_v59 = vmin.f32 %v480_v55, %v481_v57 }
  0xea   :  { %431 = vmin.xlane.f32.xlu0 %v430_v35  ;;  %v618_v60 = vmax.f32 %v469_v58, 0.0 }
  0xeb   :  { %v619_v61 = vmax.f32 %v482_v59, 0.0 }
  0xed   :  { %v622_v62 = vsel %vm609_vm4, %v619_v61, %v618_v60 }
  0xee   :  { %v625_v63 = vsel %vm624_vm5, %v622_v62, 0.0 }
  0xef   :  { %626 = vadd.xlane.f32.xlu1 %v625_v63 }
 0x155   :  { %v414_v2 = vpop.xlane.xlu1 %413 }
 0x156   :  { %v484_v1 = vmax.f32 %v414_v2, 0.0 }
 0x157   :  { %v411_v3 = vpop.xlane.xlu0 %410 }
 0x158   :  { %v483_v19 = vmax.f32 %v411_v3, 0.0  ;;  %v525_v42 = vrot.slane %v484_v1, %v524_v25 }
 0x159   :  { %v438_v4 = vpop.xlane.xlu1 %437 }
 0x15a   :  { %v492_v22 = vmax.f32 %v438_v4, 0.0  ;;  %v520_v33 = vrot.slane %v483_v19, %v861_v18 }
 0x15b   :  { %v435_v5 = vpop.xlane.xlu0 %434 }
 0x15c   :  { %v491_v16 = vmax.f32 %v435_v5, 0.0  ;;  %v577_v37 = vrot.slane %v492_v22, %v524_v25  ;;  %v527_v48 = vsel %vm526_vm6, %v525_v42, %v520_v33 }
 0x15d   :  { %v444_v7 = vpop.xlane.xlu1 %443 }
 0x15e   :  { %v573_v28 = vrot.slane %v491_v16, %v861_v18  ;;  %v494_v34 = vmax.f32 %v444_v7, 0.0 }
 0x15f   :  { %v420_v8 = vpop.xlane.xlu0 %419 }
 0x160   :  { %v486_v43 = vmax.f32 %v420_v8, 0.0  ;;  %v578_v45 = vsel %vm526_vm6, %v577_v37, %v573_v28  ;;  %v587_v49 = vrot.slane %v494_v34, %v538_v26 }
 0x161   :  { %v441_v10 = vpop.xlane.xlu1 %440 }
 0x162   :  { %v493_v21 = vmax.f32 %v441_v10, 0.0  ;;  %v539_v56 = vrot.slane %v486_v43, %v538_v26 }
 0x163   :  { %v417_v12 = vpop.xlane.xlu0 %416 }
 0x164   :  { %v485_v0 = vmax.f32 %v417_v12, 0.0  ;;  %v582_v35 = vrot.slane %v493_v21, %v531_v20 }
 0x165   :  { %v450_v17 = vpop.xlane.xlu1 %449 }
 0x166   :  { %v532_v38 = vrot.slane %v485_v0, %v531_v20  ;;  %v583_v50 = vsel %vm533_vm7, %v582_v35, %v578_v45  ;;  %v496_v57 = vmax.f32 %v450_v17, 0.0 }
 0x167   :  { %v426_v23 = vpop.xlane.xlu0 %425  ;;  %v588_v61 = vsel %vm540_vm8, %v587_v49, %v583_v50 }
 0x168   :  { %v534_v51 = vsel %vm533_vm7, %v532_v38, %v527_v48  ;;  %v488_v58 = vmax.f32 %v426_v23, 0.0  ;;  %v597_v7 = vrot.slane %v496_v57, %v552_v46 }
 0x169   :  { %v447_v31 = vpop.xlane.xlu1 %446  ;;  %v541_v62 = vsel %vm540_vm8, %v539_v56, %v534_v51 }
 0x16a   :  { %v495_v40 = vmax.f32 %v447_v31, 0.0  ;;  %v553_v8 = vrot.slane %v488_v58, %v552_v46 }
 0x16b   :  { %v423_v41 = vpop.xlane.xlu0 %422 }
 0x16c   :  { %v487_v44 = vmax.f32 %v423_v41, 0.0  ;;  %v592_v52 = vrot.slane %v495_v40, %v545_v39 }
 0x16d   :  { %v453_v47 = vpop.xlane.xlu1 %452 }
 0x16e   :  { %v546_v53 = vrot.slane %v487_v44, %v545_v39  ;;  %v497_v54 = vmax.f32 %v453_v47, 0.0  ;;  %v593_v2 = vsel %vm547_vm9, %v592_v52, %v588_v61 }
 0x16f   :  { %v429_v55 = vpop.xlane.xlu0 %428  ;;  %v598_v13 = vsel %vm554_vm10, %v597_v7, %v593_v2 }
 0x170   :  { %v489_v59 = vmax.f32 %v429_v55, 0.0  ;;  %v548_v3 = vsel %vm547_vm9, %v546_v53, %v541_v62  ;;  %v602_v4 = vrot.slane %v497_v54, %v559_v27 }
 0x171   :  { %v456_v60 = vpop.xlane.xlu1 %455  ;;  %v555_v12 = vsel %vm554_vm10, %v553_v8, %v548_v3 }
 0x172   :  { %v498_v63 = vmax.f32 %v456_v60, 0.0  ;;  %v560_v5 = vrot.slane %v489_v59, %v559_v27  ;;  %v603_v15 = vsel %vm561_vm11, %v602_v4, %v598_v13 }
 0x173   :  { %v432_v6 = vpop.xlane.xlu0 %431 }
 0x174   :  { %v607_v9 = vrot.slane %v498_v63, %v566_v30  ;;  %v490_v10 = vmax.f32 %v432_v6, 0.0  ;;  %v562_v14 = vsel %vm561_vm11, %v560_v5, %v555_v12 }
 0x176   :  { %v567_v11 = vrot.slane %v490_v10, %v566_v30  ;;  %v608_v17 = vsel %vm568_vm12, %v607_v9, %v603_v15 }
 0x178   :  { %v569_v16 = vsel %vm568_vm12, %v567_v11, %v562_v14  ;;  %v627_v21 = vpop.xlane.xlu1 %626 }
 0x179   :  { %v610_v19 = vsel %vm609_vm4, %v608_v17, %v569_v16  ;;  %v629_v0 = vmul.f32 0.010416667, %v627_v21 }
 0x17a   :  { %v613_v20 = vsel %vm612_vm13, %v610_v19, 0.0 }
 0x17b   :  { %614 = vadd.xlane.f32.xlu0 %v613_v20 }
 0x204   :  { %v615_v22 = vpop.xlane.xlu0 %614 }
 0x205   :  { %v617_v23 = vmul.f32 0.015625, %v615_v22 }
 0x207   :  { %v630_v24 = vadd.f32 %v629_v0, %v617_v23 }
 0x209   :  { %v635_v25 = vrot.slane %v630_v24, %v861_v18 }
 0x20b   :  { %638 = vst.msk [vmem:[%s882_s2] sm:$0x1] %vm637_vm14, %v635_v25 }

</bundles_post_ra>
